<compile_context>
chip_gen: v7x
topology: tpu7x:2x2x1
jax: 0.10.0
libtpu: 0.0.40
codegen_flags: <defaults>
</compile_context>

<pallas_src>
import functools

import jax
import jax.numpy as jnp
from jax.experimental import pallas as pl
from jax.experimental.pallas import tpu as pltpu


def _round_up(x, m):
    return ((x + m - 1) // m) * m


def _triplet_kernel(a_ref, p_ref, n_ref, out_ref, acc_ref, *, margin, num_valid):
    i = pl.program_id(0)

    @pl.when(i == 0)
    def _():
        acc_ref[...] = jnp.zeros_like(acc_ref)

    a = a_ref[...]                                        # (TR, Dp) f32
    dp = a - p_ref[...]
    dn = a - n_ref[...]
    pos_d = jnp.sum(dp * dp, axis=-1, keepdims=True)      # (TR, 1) XLU reduce
    neg_d = jnp.sum(dn * dn, axis=-1, keepdims=True)      # (TR, 1)
    # Padded rows: anchor/pos are 0, neg is a large constant -> neg_d is huge
    # -> hinge is exactly 0, so no masking is needed here.
    acc_ref[...] += jnp.maximum(margin + pos_d - neg_d, 0.0)

    @pl.when(i == pl.num_programs(0) - 1)
    def _():
        total = jnp.sum(acc_ref[...], axis=0, keepdims=True)        # (1, 1)
        mean = total * (1.0 / float(num_valid))
        out_ref[...] = jnp.broadcast_to(mean, out_ref.shape)        # lane-dense store


@functools.partial(jax.jit, static_argnames=("margin",))
def triplet_loss_pallas(anchor, pos, neg, *, margin):
    """mean(max(0, margin + ||a-p||^2 - ||a-n||^2)), norms over the last axis."""
    D = anchor.shape[-1]
    a2 = anchor.reshape(-1, D).astype(jnp.float32)
    p2 = pos.reshape(-1, D).astype(jnp.float32)
    n2 = neg.reshape(-1, D).astype(jnp.float32)
    R = a2.shape[0]

    Dp = _round_up(D, 128)
    # Largest row tile that keeps 3 inputs x 2 buffers comfortably inside the
    # default scoped-VMEM limit on v5e/v6e/v7x (~2 MiB per input block).
    rows_cap = max(8, ((2 * 1024 * 1024) // (Dp * 4)) // 8 * 8)
    tile_rows = min(_round_up(R, 8), rows_cap, 2048)
    Rp = _round_up(R, tile_rows)

    def pad(x, row_value):
        x = jnp.pad(x, ((0, 0), (0, Dp - D)))                      # lane pad: zeros
        return jnp.pad(x, ((0, Rp - R), (0, 0)), constant_values=row_value)

    a2 = pad(a2, 0.0)
    p2 = pad(p2, 0.0)
    n2 = pad(n2, 1e3)   # big value => padded rows contribute exactly 0 hinge

    kernel = functools.partial(_triplet_kernel, margin=float(margin), num_valid=R)
    row_spec = pl.BlockSpec((tile_rows, Dp), lambda i: (i, 0))

    out = pl.pallas_call(
        kernel,
        out_shape=jax.ShapeDtypeStruct((8, 128), jnp.float32),
        grid_spec=pltpu.PrefetchScalarGridSpec(
            num_scalar_prefetch=0,
            grid=(Rp // tile_rows,),
            in_specs=[row_spec, row_spec, row_spec],
            out_specs=pl.BlockSpec((8, 128), lambda i: (0, 0)),
            scratch_shapes=[pltpu.VMEM((tile_rows, 1), jnp.float32)],
        ),
        compiler_params=pltpu.CompilerParams(
            dimension_semantics=("arbitrary",)),   # grid axis is a reduction
    )(a2, p2, n2)
    return out[0, 0]


class TripletLoss:
    """Mirrors the PyTorch module; forward() runs the fused Pallas kernel."""

    def __init__(self, mod, reverse_margins):
        self.mod = mod
        self.margin_step = 0
        self.count = 0
        self.margins = [12.5, 10, 7.5, 3.5, 1]
        if reverse_margins:
            self.margins.reverse()

    def update_margin(self):
        self.count += 1
        if self.mod:
            self.margin_step = self.count % len(self.margins)
        else:
            self.margin_step = min(self.count, len(self.margins) - 1)

    def __call__(self, anchor, pos, neg):
        # TODO(synk): margin schedule (count/mod bookkeeping) stays host-side
        # Python state, exactly as in the nn.Module; it is not kernel work.
        return triplet_loss_pallas(
            anchor, pos, neg, margin=float(self.margins[self.margin_step]))


def _triplet_loss_ref(anchor, pos, neg, margin):
    pos_d = jnp.sum(jnp.square(jnp.abs(anchor - pos)), axis=-1)
    neg_d = jnp.sum(jnp.square(jnp.abs(anchor - neg)), axis=-1)
    return jnp.mean(jnp.maximum(margin + pos_d - neg_d, 0.0))


if __name__ == "__main__":
    key = jax.random.PRNGKey(0)
    ka, kp, kn = jax.random.split(key, 3)
    # (batch, seq, hidden) embeddings; distance over hidden, mean over the rest.
    B, S, D = 2, 5, 32
    anchor = jax.random.normal(ka, (B, S, D), jnp.float32)
    pos = jax.random.normal(kp, (B, S, D), jnp.float32)
    neg = jax.random.normal(kn, (B, S, D), jnp.float32)

    loss_mod = TripletLoss(mod=False, reverse_margins=False)
    loss = loss_mod(anchor, pos, neg)
    jax.block_until_ready(loss)

    ref = _triplet_loss_ref(anchor, pos, neg,
                            loss_mod.margins[loss_mod.margin_step])
    assert jnp.allclose(loss, ref, rtol=1e-5, atol=1e-4), (loss, ref)
    print("KERNEL_OK")
</pallas_src>

<mosaic_0001>
module attributes {stable_mosaic.version = 11 : i64} {
  func.func @_triplet_kernel(%arg0: i32, %arg1: memref<16x128xf32, #tpu.memory_space<vmem>>, %arg2: memref<16x128xf32, #tpu.memory_space<vmem>>, %arg3: memref<16x128xf32, #tpu.memory_space<vmem>>, %arg4: memref<8x128xf32, #tpu.memory_space<vmem>>, %arg5: memref<16x1xf32, #tpu.memory_space<vmem>>) attributes {dimension_semantics = [#tpu.dimension_semantics<arbitrary>], iteration_bounds = array<i64: 1>, scalar_prefetch = 0 : i64, scratch_operands = 1 : i64, tpu.core_type = #tpu.core_type<tc>, window_params = [{transform_indices = @transform_0, window_bounds = array<i64: 16, 128>}, {transform_indices = @transform_1, window_bounds = array<i64: 16, 128>}, {transform_indices = @transform_2, window_bounds = array<i64: 16, 128>}, {pipeline_mode = #tpu.pipeline_mode<synchronous>, transform_indices = @transform_3, window_bounds = array<i64: 8, 128>}]} {
    %c0_i32 = arith.constant 0 : i32
    %0 = arith.cmpi eq, %arg0, %c0_i32 : i32
    %1 = arith.extui %0 : i1 to i32
    %c0_i32_0 = arith.constant 0 : i32
    %2 = arith.cmpi ne, %1, %c0_i32_0 : i32
    scf.if %2 {
      %cst_15 = arith.constant 0.000000e+00 : f32
      %25 = vector.broadcast %cst_15 : f32 to vector<16x1xf32>
      %c0_16 = arith.constant 0 : index
      %c0_17 = arith.constant 0 : index
      %26 = vector.load %arg5[%c0_16, %c0_17] : memref<16x1xf32, #tpu.memory_space<vmem>>, vector<16x1xf32>
      tpu.vector_store %arg5[%c0_16, %c0_17], %25 {strides = array<i32>} : memref<16x1xf32, #tpu.memory_space<vmem>>, vector<16x1xf32>,
    } else {
    }
    %c0 = arith.constant 0 : index
    %c0_1 = arith.constant 0 : index
    %3 = vector.load %arg1[%c0, %c0_1] : memref<16x128xf32, #tpu.memory_space<vmem>>, vector<16x128xf32>
    %c0_2 = arith.constant 0 : index
    %c0_3 = arith.constant 0 : index
    %4 = vector.load %arg2[%c0_2, %c0_3] : memref<16x128xf32, #tpu.memory_space<vmem>>, vector<16x128xf32>
    %5 = arith.subf %3, %4 : vector<16x128xf32>
    %c0_4 = arith.constant 0 : index
    %c0_5 = arith.constant 0 : index
    %6 = vector.load %arg3[%c0_4, %c0_5] : memref<16x128xf32, #tpu.memory_space<vmem>>, vector<16x128xf32>
    %7 = arith.subf %3, %6 : vector<16x128xf32>
    %8 = arith.mulf %5, %5 : vector<16x128xf32>
    %cst = arith.constant dense<0.000000e+00> : vector<16xf32>
    %9 = vector.multi_reduction <add>, %8, %cst [1] : vector<16x128xf32> to vector<16xf32>
    %10 = vector.shape_cast %9 : vector<16xf32> to vector<16x1xf32>
    %11 = arith.mulf %7, %7 : vector<16x128xf32>
    %cst_6 = arith.constant dense<0.000000e+00> : vector<16xf32>
    %12 = vector.multi_reduction <add>, %11, %cst_6 [1] : vector<16x128xf32> to vector<16xf32>
    %13 = vector.shape_cast %12 : vector<16xf32> to vector<16x1xf32>
    %c0_7 = arith.constant 0 : index
    %c0_8 = arith.constant 0 : index
    %14 = vector.load %arg5[%c0_7, %c0_8] : memref<16x1xf32, #tpu.memory_space<vmem>>, vector<16x1xf32>
    %cst_9 = arith.constant 1.250000e+01 : f32
    %15 = vector.broadcast %cst_9 : f32 to vector<16x1xf32>
    %16 = arith.addf %15, %10 : vector<16x1xf32>
    %17 = arith.subf %16, %13 : vector<16x1xf32>
    %cst_10 = arith.constant 0.000000e+00 : f32
    %18 = vector.broadcast %cst_10 : f32 to vector<16x1xf32>
    %19 = arith.maximumf %17, %18 : vector<16x1xf32>
    %20 = arith.addf %14, %19 : vector<16x1xf32>
    %c0_11 = arith.constant 0 : index
    %c0_12 = arith.constant 0 : index
    %21 = vector.load %arg5[%c0_11, %c0_12] : memref<16x1xf32, #tpu.memory_space<vmem>>, vector<16x1xf32>
    tpu.vector_store %arg5[%c0_11, %c0_12], %20 {strides = array<i32>} : memref<16x1xf32, #tpu.memory_space<vmem>>, vector<16x1xf32>,
    %c0_i32_13 = arith.constant 0 : i32
    %22 = arith.cmpi eq, %arg0, %c0_i32_13 : i32
    %23 = arith.extui %22 : i1 to i32
    %c0_i32_14 = arith.constant 0 : i32
    %24 = arith.cmpi ne, %23, %c0_i32_14 : i32
    scf.if %24 {
      %c0_15 = arith.constant 0 : index
      %c0_16 = arith.constant 0 : index
      %25 = vector.load %arg5[%c0_15, %c0_16] : memref<16x1xf32, #tpu.memory_space<vmem>>, vector<16x1xf32>
      %cst_17 = arith.constant dense<0.000000e+00> : vector<1xf32>
      %26 = vector.multi_reduction <add>, %25, %cst_17 [0] : vector<16x1xf32> to vector<1xf32>
      %27 = vector.shape_cast %26 : vector<1xf32> to vector<1x1xf32>
      %cst_18 = arith.constant 1.000000e-01 : f32
      %28 = vector.broadcast %cst_18 : f32 to vector<1x1xf32>
      %29 = arith.mulf %27, %28 : vector<1x1xf32>
      %30 = vector.shape_cast %29 : vector<1x1xf32> to vector<1x1xf32>
      %31 = vector.broadcast %30 : vector<1x1xf32> to vector<8x128xf32>
      %c0_19 = arith.constant 0 : index
      %c0_20 = arith.constant 0 : index
      %32 = vector.load %arg4[%c0_19, %c0_20] : memref<8x128xf32, #tpu.memory_space<vmem>>, vector<8x128xf32>
      tpu.vector_store %arg4[%c0_19, %c0_20], %31 {strides = array<i32>} : memref<8x128xf32, #tpu.memory_space<vmem>>, vector<8x128xf32>,
    } else {
    }
    return
  }
  func.func @transform_0(%arg0: i32) -> (i32, i32) {
    %c0_i32 = arith.constant 0 : i32
    %c0_i32_0 = arith.constant 0 : i32
    return %arg0, %c0_i32 : i32, i32
  }
  func.func @transform_1(%arg0: i32) -> (i32, i32) {
    %c0_i32 = arith.constant 0 : i32
    %c0_i32_0 = arith.constant 0 : i32
    return %arg0, %c0_i32 : i32, i32
  }
  func.func @transform_2(%arg0: i32) -> (i32, i32) {
    %c0_i32 = arith.constant 0 : i32
    %c0_i32_0 = arith.constant 0 : i32
    return %arg0, %c0_i32 : i32, i32
  }
  func.func @transform_3(%arg0: i32) -> (i32, i32) {
    %c0_i32 = arith.constant 0 : i32
    %c0_i32_0 = arith.constant 0 : i32
    %c0_i32_1 = arith.constant 0 : i32
    return %c0_i32, %c0_i32_0 : i32, i32
  }
}

</mosaic_0001>

<bundles_post_ra>
// kernel: triplet_loss_pallas.1
= control target key start
LH: loop header
LB: loop body
LE: loop exit
PB: predicated region body
PF: predicated region fallthrough
CT: control target
= control target key end

     0   :  { %vm18_vm0 = vcmask 7168   ;;  %v84_v14 = vmov 0.0   ;;  %v85_v15 = vmov 0   ;;  %s133_s0 = inlined_call_operand.vmem [shape: f32[16,128], index: 0, kind: input, shape index: {}]   ;;  %s134_s1 = inlined_call_operand.vmem [shape: f32[16,128], index: 1, kind: input, shape index: {}]   ;;  %s135_s2 = inlined_call_operand.vmem [shape: f32[16,128], index: 2, kind: input, shape index: {}]   ;;  %s136_s3 = inlined_call_operand.vmem [shape: f32[8,128], index: 3, kind: output, shape index: {}]  }
   0x1   :  { %v21_v0 = vld [vmem:[%s133_s0] sm:$0xff]  ;;  %v22_v5 = vld [vmem:[%s133_s0 + $0x8] sm:$0xff]  ;;  %19 = vst.msk [vmem:[#allocation2] sm:$0xff] %vm18_vm0, %v84_v14  ;;  %20 = vst.msk [vmem:[#allocation2 + $0x8] sm:$0xff] %vm18_vm0, %v84_v14  ;;  %83 = vset.pattern.permute.xlu0 %v85_v15 }
   0x2   :  { %v23_v1 = vld [vmem:[%s134_s1] sm:$0xff]  ;;  %v24_v6 = vld [vmem:[%s134_s1 + $0x8] sm:$0xff] }
   0x3   :  { %v27_v2 = vld [vmem:[%s135_s2] sm:$0xff]  ;;  %v25_v3 = vsub.f32 %v21_v0, %v23_v1  ;;  %v28_v7 = vld [vmem:[%s135_s2 + $0x8] sm:$0xff]  ;;  %v26_v8 = vsub.f32 %v22_v5, %v24_v6 }
   0x4   :  { %v29_v4 = vsub.f32 %v21_v0, %v27_v2  ;;  %v30_v9 = vsub.f32 %v22_v5, %v28_v7 }
   0x5   :  { %v31_v10 = vmul.f32 %v25_v3, %v25_v3  ;;  %v32_v12 = vmul.f32 %v26_v8, %v26_v8 }
   0x6   :  { %v37_v11 = vmul.f32 %v29_v4, %v29_v4  ;;  %v38_v13 = vmul.f32 %v30_v9, %v30_v9 }
   0x7   :  { %33 = vadd.xlane.f32.xlu0 %v31_v10 }
   0x8   :  { %39 = vadd.xlane.f32.xlu1 %v37_v11  ;;  %v43_v20 = vld [vmem:[#allocation2] sm:$0xff]  ;;  %v44_v27 = vld [vmem:[#allocation2 + $0x8] sm:$0xff] }
   0xb   :  { %35 = vadd.xlane.f32.xlu0 %v32_v12 }
   0xc   :  { %41 = vadd.xlane.f32.xlu1 %v38_v13 }
  0x94   :  { %v34_v16 = vpop.xlane.xlu0 %33 }
  0x95   :  { %v40_v17 = vpop.xlane.xlu1 %39  ;;  %v45_v18 = vadd.f32 12.5, %v34_v16 }
  0x97   :  { %v47_v19 = vsub.f32 %v45_v18, %v40_v17 }
  0x98   :  { %v36_v21 = vpop.xlane.xlu0 %35 }
  0x99   :  { %v42_v22 = vpop.xlane.xlu1 %41  ;;  %v49_v23 = vmax.f32 %v47_v19, 0.0  ;;  %v46_v24 = vadd.f32 12.5, %v36_v21 }
  0x9b   :  { %v51_v25 = vadd.f32 %v49_v23, %v43_v20  ;;  %v48_v26 = vsub.f32 %v46_v24, %v42_v22 }
  0x9d   :  { %54 = vst.msk [vmem:[#allocation2] sm:$0xff] %vm18_vm0, %v51_v25  ;;  %v50_v28 = vmax.f32 %v48_v26, 0.0 }
  0x9f   :  { %v52_v29 = vadd.f32 %v50_v28, %v44_v27 }
  0xa1   :  { %55 = vst.msk [vmem:[#allocation2 + $0x8] sm:$0xff] %vm18_vm0, %v52_v29 }
  0xa4   :  { %v59_v30 = vld [vmem:[#allocation2] sm:$0xff] }
  0xa5   :  { %v61_v32 = vsel %vm18_vm0, %v59_v30, 0.0 }
  0xa8   :  { %v60_v31 = vld [vmem:[#allocation2 + $0x8] sm:$0xff] }
  0xa9   :  { %v62_v33 = vsel %vm18_vm0, %v60_v31, 0.0 }
  0xaa   :  { %v63_v34 = vadd.f32 %v62_v33, %v61_v32 }
  0xac   :  { %v64_v35 = vrot.slane %v63_v34, 4 }
  0xae   :  { %v65_v36 = vadd.f32 %v64_v35, %v63_v34 }
  0xb0   :  { %v66_v37 = vrot.slane %v65_v36, 2 }
  0xb2   :  { %v67_v38 = vadd.f32 %v66_v37, %v65_v36 }
  0xb4   :  { %v68_v39 = vrot.slane %v67_v38, 1 }
  0xb6   :  { %v69_v40 = vadd.f32 %v68_v39, %v67_v38 }
  0xb8   :  { %v70_v41 = vmul.f32 0.1, %v69_v40 }
  0xba   :  { %73 = vperm.xlu0 %83, %v70_v41  }
 0x139   :  { %v74_v42 = vpop.permute.xlu0 %73 }
 0x13a   :  { %76 = vst [vmem:[%s136_s3] sm:$0xff] %v74_v42 }

</bundles_post_ra>
